<compile_context>
chip_gen: v6e
topology: v6e:2x2x1
jax: 0.10.0
libtpu: 0.0.40
codegen_flags: <defaults>
</compile_context>

<pallas_src>
import jax
import jax.numpy as jnp
import numpy as np
from jax.experimental import pallas as pl
from jax.experimental.pallas import tpu as pltpu

B, D_IN, H, D_OUT, K = 8, 32, 32, 16, 4


def fitness_kernel(x_ref, we_ref, be_ref, eps_ref, wd_ref, bd_ref, out_ref):
    """Single invocation: encoder -> reparameterize all k samples -> decoder.

    Shapes seen by the kernel (whole arrays resident in VMEM):
      x_ref   (B, D_IN)
      we_ref  (D_IN, 2H),  be_ref (1, 2H)
      eps_ref (K*B, H)      -- k-major: row j*B + b is sample j of batch b
      wd_ref  (H, D_OUT),  bd_ref (1, D_OUT)
      out_ref (K*B, D_OUT)
    """
    b = x_ref.shape[0]
    h = wd_ref.shape[0]
    k = eps_ref.shape[0] // b

    # Encoder: one (B, D_IN) @ (D_IN, 2H) matmul.
    enc = (jnp.dot(x_ref[...], we_ref[...], preferred_element_type=jnp.float32)
           + be_ref[...])                              # (B, 2H)
    mu = enc[:, :h]                                    # (B, H)
    sigma = jnp.exp(0.5 * enc[:, h:])                  # (B, H), EUP once

    # Replicate mu/sigma k times along the sublane axis to match the
    # k-major eps layout (cheap sublane concat, no in-kernel reshape).
    mu_t = jnp.concatenate([mu] * k, axis=0)           # (K*B, H)
    sigma_t = jnp.concatenate([sigma] * k, axis=0)     # (K*B, H)

    # Reparameterization for all k samples in one vreg-wide pass.
    h_samples = mu_t + eps_ref[...] * sigma_t          # (K*B, H)

    # Decoder: one (K*B, H) @ (H, D_OUT) matmul, one contiguous store.
    out_ref[...] = (jnp.dot(h_samples, wd_ref[...],
                            preferred_element_type=jnp.float32)
                    + bd_ref[...])                     # (K*B, D_OUT)


def fitness_function(x, w_enc, b_enc, eps, w_dec, b_dec):
    k, b, h = eps.shape
    d_out = w_dec.shape[1]
    eps2d = eps.reshape(k * b, h)                      # free HBM-side reshape

    vmem = pl.BlockSpec(memory_space=pltpu.MemorySpace.VMEM)
    heads_2d = pl.pallas_call(
        fitness_kernel,
        out_shape=jax.ShapeDtypeStruct((k * b, d_out), jnp.float32),
        in_specs=[vmem] * 6,
        out_specs=vmem,
    )(x, w_enc, b_enc, eps2d, w_dec, b_dec)

    heads = heads_2d.reshape(k, b, d_out)              # (k, B, D_OUT)
    # torch heads are (B, k, D_OUT); movedim(-1, 0) -> (D_OUT, B, k).
    # kernel output is (k, B, D_OUT), so transpose (2, 1, 0).
    return jnp.transpose(heads, (2, 1, 0))


def reference(x, w_enc, b_enc, eps, w_dec, b_dec):
    enc = x @ w_enc + b_enc                            # (B, 2H)
    mu, logvar = enc[:, :H], enc[:, H:]
    h = mu[None] + eps * jnp.exp(0.5 * logvar)[None]   # (k, B, H)
    heads = h @ w_dec + b_dec                          # (k, B, D_OUT)
    return jnp.transpose(heads, (2, 1, 0))             # (D_OUT, B, k)


if __name__ == "__main__":
    key = jax.random.PRNGKey(0)
    k_x, k_we, k_be, k_eps, k_wd, k_bd = jax.random.split(key, 6)

    x = jax.random.normal(k_x, (B, D_IN), dtype=jnp.float32)
    # Deterministic synthetic parameters (shapes from the module structure).
    w_enc = jax.random.normal(k_we, (D_IN, 2 * H), dtype=jnp.float32) * 0.1
    b_enc = jax.random.normal(k_be, (1, 2 * H), dtype=jnp.float32) * 0.1
    w_dec = jax.random.normal(k_wd, (H, D_OUT), dtype=jnp.float32) * 0.1
    b_dec = jax.random.normal(k_bd, (1, D_OUT), dtype=jnp.float32) * 0.1
    # Sampler noise for k samples (reparameterization trick), deterministic.
    eps = jax.random.normal(k_eps, (K, B, H), dtype=jnp.float32)

    out = fitness_function(x, w_enc, b_enc, eps, w_dec, b_dec)
    out = jax.block_until_ready(out)

    ref = reference(x, w_enc, b_enc, eps, w_dec, b_dec)
    assert out.shape == (D_OUT, B, K), out.shape
    np.testing.assert_allclose(np.asarray(out), np.asarray(ref),
                               rtol=1e-5, atol=1e-5)
    print("KERNEL_OK")
</pallas_src>

<mosaic_0001>
module attributes {stable_mosaic.version = 11 : i64} {
  func.func @fitness_kernel(%arg0: memref<8x32xf32, #tpu.memory_space<vmem>>, %arg1: memref<32x64xf32, #tpu.memory_space<vmem>>, %arg2: memref<1x64xf32, #tpu.memory_space<vmem>>, %arg3: memref<32x32xf32, #tpu.memory_space<vmem>>, %arg4: memref<32x16xf32, #tpu.memory_space<vmem>>, %arg5: memref<1x16xf32, #tpu.memory_space<vmem>>, %arg6: memref<32x16xf32, #tpu.memory_space<vmem>>) attributes {dimension_semantics = [], scalar_prefetch = 0 : i64, scratch_operands = 0 : i64, tpu.core_type = #tpu.core_type<tc>} {
    %c0 = arith.constant 0 : index
    %c0_0 = arith.constant 0 : index
    %0 = vector.load %arg0[%c0, %c0_0] : memref<8x32xf32, #tpu.memory_space<vmem>>, vector<8x32xf32>
    %c0_1 = arith.constant 0 : index
    %c0_2 = arith.constant 0 : index
    %1 = vector.load %arg1[%c0_1, %c0_2] : memref<32x64xf32, #tpu.memory_space<vmem>>, vector<32x64xf32>
    %cst = arith.constant dense<0.000000e+00> : vector<8x64xf32>
    %2 = tpu.matmul %0, %1, %cst {dimension_numbers = #tpu.dot_dimension_numbers<[1], [0], [0], [1], [0, 0, 1, 1], [], []>} : vector<8x32xf32>, vector<32x64xf32>, vector<8x64xf32> -> vector<8x64xf32>
    %c0_3 = arith.constant 0 : index
    %c0_4 = arith.constant 0 : index
    %3 = vector.load %arg2[%c0_3, %c0_4] : memref<1x64xf32, #tpu.memory_space<vmem>>, vector<1x64xf32>
    %4 = vector.broadcast %3 : vector<1x64xf32> to vector<8x64xf32>
    %5 = arith.addf %2, %4 : vector<8x64xf32>
    %6 = vector.extract_strided_slice %5 {offsets = [0, 0], sizes = [8, 32], strides = [1, 1]} : vector<8x64xf32> to vector<8x32xf32>
    %7 = vector.extract_strided_slice %5 {offsets = [0, 32], sizes = [8, 32], strides = [1, 1]} : vector<8x64xf32> to vector<8x32xf32>
    %cst_5 = arith.constant 5.000000e-01 : f32
    %8 = vector.broadcast %cst_5 : f32 to vector<8x32xf32>
    %9 = arith.mulf %8, %7 : vector<8x32xf32>
    %10 = math.exp %9 : vector<8x32xf32>
    %11 = tpu.concatenate %6, %6, %6, %6 in 0 : vector<8x32xf32>, vector<8x32xf32>, vector<8x32xf32>, vector<8x32xf32> -> vector<32x32xf32>
    %12 = tpu.concatenate %10, %10, %10, %10 in 0 : vector<8x32xf32>, vector<8x32xf32>, vector<8x32xf32>, vector<8x32xf32> -> vector<32x32xf32>
    %c0_6 = arith.constant 0 : index
    %c0_7 = arith.constant 0 : index
    %13 = vector.load %arg3[%c0_6, %c0_7] : memref<32x32xf32, #tpu.memory_space<vmem>>, vector<32x32xf32>
    %14 = arith.mulf %13, %12 : vector<32x32xf32>
    %15 = arith.addf %11, %14 : vector<32x32xf32>
    %c0_8 = arith.constant 0 : index
    %c0_9 = arith.constant 0 : index
    %16 = vector.load %arg4[%c0_8, %c0_9] : memref<32x16xf32, #tpu.memory_space<vmem>>, vector<32x16xf32>
    %cst_10 = arith.constant dense<0.000000e+00> : vector<32x16xf32>
    %17 = tpu.matmul %15, %16, %cst_10 {dimension_numbers = #tpu.dot_dimension_numbers<[1], [0], [0], [1], [0, 0, 1, 1], [], []>} : vector<32x32xf32>, vector<32x16xf32>, vector<32x16xf32> -> vector<32x16xf32>
    %c0_11 = arith.constant 0 : index
    %c0_12 = arith.constant 0 : index
    %18 = vector.load %arg5[%c0_11, %c0_12] : memref<1x16xf32, #tpu.memory_space<vmem>>, vector<1x16xf32>
    %19 = vector.broadcast %18 : vector<1x16xf32> to vector<32x16xf32>
    %20 = arith.addf %17, %19 : vector<32x16xf32>
    %c0_13 = arith.constant 0 : index
    %c0_14 = arith.constant 0 : index
    %21 = vector.load %arg6[%c0_13, %c0_14] : memref<32x16xf32, #tpu.memory_space<vmem>>, vector<32x16xf32>
    tpu.vector_store %arg6[%c0_13, %c0_14], %20 {strides = array<i32>} : memref<32x16xf32, #tpu.memory_space<vmem>>, vector<32x16xf32>,
    return
  }
}

</mosaic_0001>

<bundles_post_ra>
// kernel: tpu_custom_call.1
= control target key start
LH: loop header
LB: loop body
LE: loop exit
PB: predicated region body
PF: predicated region fallthrough
CT: control target
= control target key end

     0   :  { %11 = vsyncpa [#allocation3], 0  ;;  %s335_s21 = smov [#allocation2]   ;;  %s429_s0 = inlined_call_operand.vmem [shape: f32[8,32], index: 0, kind: input, shape index: {}]   ;;  %s430_s1 = inlined_call_operand.vmem [shape: f32[32,64], index: 1, kind: input, shape index: {}]   ;;  %s431_s2 = inlined_call_operand.vmem [shape: f32[1,64], index: 2, kind: input, shape index: {}]   ;;  %s432_s3 = inlined_call_operand.hbm [shape: f32[32,32], index: 3, kind: input, shape index: {}]   ;;  %s433_s4 = inlined_call_operand.vmem [shape: f32[32,16], index: 4, kind: input, shape index: {}]   ;;  %s434_s5 = inlined_call_operand.vmem [shape: f32[1,16], index: 5, kind: input, shape index: {}]   ;;  %s435_s6 = inlined_call_operand.vmem [shape: f32[32,16], index: 6, kind: output, shape index: {}]  }
   0x1   :  { %s23_s22 = sshll.u32 %s335_s21, 4  ;;  %s24_s22 = int_to_ptr.vmem [resolvable:$true] %s23_s22 }
   0x2   :  { %s321_s23 = scalar_lea.vmem %s24_s22, 512  ;;  %p326_p1 = scmp.lt.s32.totalorder %s24_s22, %s24_s22 }
   0x3   :  { %p322_p0 = scmp.ne.s32.totalorder %s24_s22, %s321_s23  ;;  %p327_p2 = scmp.lt.s32.totalorder %s321_s23, %s321_s23 }
   0x5   :  { %p328_p3 = por %p327_p2, %p326_p1 }
   0x7   :  { %p329_p4 = pnand %p328_p3, %p322_p0 }
   0x9   :  { %332 = shalt.err (!%p329_p4)
}
   0xa   :  { %s336_s24 = smov 128   ;;  %s337_s25 = smov 8  }
   0xb   :  { %29 = dma.hbm_to_vmem [thread:$0]  %s432_s3, 512, %s24_s22, [#allocation3], %s336_s24, %s336_s24, %s337_s25  }
   0xc   :  { %333 = dma.done.wait [#allocation3], 512  }
   0xd   :  { %334 = vsyncadd [#allocation3], 4294966784  ;;  %v338_v0 = vmov 0.0   ;;  %vm339_vm0 = vmmov 0   ;;  %v41_v1 = vld [vmem:[%s430_s1 + $0x18] sm:$0xff]  ;;  %v40_v2 = vld [vmem:[%s430_s1 + $0x10] sm:$0xff] }
   0xe   :  { %280 = vmatprep.subr.mxu0 %v338_v0  ;;  %288 = vmatprep.mubr.msk.f32.mxu0 %vm339_vm0, %v338_v0  ;;  %v39_v3 = vld [vmem:[%s430_s1 + $0x8] sm:$0xff]  ;;  %v38_v4 = vld [vmem:[%s430_s1] sm:$0xff]  ;;  %vm49_vm1 = vcmask 261120   ;;  %v145_v6 = vld [vmem:[%s433_s4 + $0x18] sm:$0xff]  ;;  %s340_s20 = smov 96   ;;  %vm250_vm2 = vcmask 130048  }
   0xf   :  { %281 = vmatpush3.msra.mxu0 %v41_v1  ;;  %v37_v5 = vld [vmem:[%s429_s0] sm:$0xff]  ;;  %291 = vmatprep.subr.mxu1 %v145_v6  ;;  %v144_v13 = vld [vmem:[%s433_s4 + $0x10] sm:$0xff]  ;;  %v143_v14 = vld [vmem:[%s433_s4 + $0x8] sm:$0xff] }
  0x10   :  { %282 = vmatprep.subr.mxu0 %v338_v0  ;;  %292 = vmatpush3.msra.mxu1 %v145_v6  ;;  %v260_v7 = vld [vmem:[%s431_s2] ss:$0 sm:$0xff]  ;;  %v127_v17 = vld [vmem:[#allocation2 + $0x8] sm:$0xff]  ;;  %v128_v18 = vld [vmem:[#allocation2 + $0x10] sm:$0xff] }
  0x11   :  { %283 = vmatpush3.msra.mxu0 %v40_v2  ;;  %293 = vmatprep.subr.mxu1 %v144_v13  ;;  %v142_v15 = vld [vmem:[%s433_s4] sm:$0xff]  ;;  %v129_v21 = vld [vmem:[#allocation2 + $0x18] sm:$0xff] }
  0x12   :  { %284 = vmatprep.subr.mxu0 %v338_v0  ;;  %294 = vmatpush3.msra.mxu1 %v144_v13  ;;  %v126_v19 = vld [vmem:[#allocation2] sm:$0xff] }
  0x13   :  { %285 = vmatpush3.msra.mxu0 %v39_v3  ;;  %295 = vmatprep.subr.mxu1 %v143_v14  ;;  %v262_v30 = vld [vmem:[%s434_s5] ss:$0 sm:$0xff] }
  0x14   :  { %286 = vmatprep.subr.mxu0 %v338_v0  ;;  %296 = vmatpush3.msra.mxu1 %v143_v14 }
  0x15   :  { %287 = vmatpush3.msra.mxu0 %v38_v4  ;;  %297 = vmatprep.subr.mxu1 %v142_v15 }
  0x16   :  { %289 = vmatmul.mubr.msk.f32.vlgmr.msra.gmra.mxu0 %vm49_vm1, %v37_v5  ;;  %298 = vmatpush3.msra.mxu1 %v142_v15 }
  0xd6   :  { %v119_v8 = vpop.f32.mrf.mxu0 }
  0xd7   :  { %v120_v9 = vadd.f32 %v260_v7, %v119_v8 }
  0xd8   :  { %v290_v10 = vpop.f32.mrf.mxu0 }
  0xd9   :  { %v123_v11 = vmul.f32 0.5, %v120_v9 }
  0xdb   :  { %v124_v12 = vmul.f32 1.442695, %v123_v11 }
  0xdd   :  { %311 = vpow2.f32 %v124_v12 }
  0xea   :  { %v312_v16 = vpop.eup %311 }
  0xeb   :  { %131 = vrot.lane.b32.xlu0 %v312_v16, %s340_s20 }
 0x15d   :  { %v132_v20 = vpop.permute.xlu0 %131 }
 0x15e   :  { %v135_v22 = vmul.f32 %v132_v20, %v127_v17  ;;  %v136_v23 = vmul.f32 %v132_v20, %v128_v18  ;;  %v134_v24 = vmul.f32 %v132_v20, %v126_v19  ;;  %v137_v27 = vmul.f32 %v132_v20, %v129_v21 }
 0x160   :  { %v139_v25 = vadd.f32 %v135_v22, %v120_v9  ;;  %v138_v26 = vadd.f32 %v134_v24, %v120_v9  ;;  %v140_v28 = vadd.f32 %v136_v23, %v120_v9  ;;  %v141_v29 = vadd.f32 %v137_v27, %v120_v9 }
 0x162   :  { %299 = vmatprep.mubr.msk.f32.mxu1 %vm49_vm1, %v138_v26 }
 0x163   :  { %300 = vmatmul.mubr.msk.f32.vlgmr.msra.gmra.mxu1 %vm49_vm1, %v139_v25 }
 0x164   :  { %302 = vmatprep.mubr.msk.f32.mxu1 %vm49_vm1, %v140_v28 }
 0x167   :  { %303 = vmatmul.mubr.msk.f32.gmra.mxu1 %vm49_vm1, %v141_v29 }
 0x223   :  { %v301_v31 = vpop.f32.mrf.mxu1 }
 0x224   :  { %v237_v32 = vadd.f32 %v301_v31, %v262_v30 }
 0x225   :  { %v231_v33 = vpop.f32.mrf.mxu1 }
 0x226   :  { %252 = vst.msk [vmem:[%s435_s6 + $0x8] sm:$0xff] %vm250_vm2, %v237_v32  ;;  %v232_v34 = vadd.f32 %v262_v30, %v231_v33 }
 0x227   :  { %v304_v35 = vpop.f32.mrf.mxu1 }
 0x228   :  { %251 = vst.msk [vmem:[%s435_s6] sm:$0xff] %vm250_vm2, %v232_v34  ;;  %v247_v36 = vadd.f32 %v304_v35, %v262_v30 }
 0x229   :  { %v241_v37 = vpop.f32.mrf.mxu1 }
 0x22a   :  { %254 = vst.msk [vmem:[%s435_s6 + $0x18] sm:$0xff] %vm250_vm2, %v247_v36  ;;  %v242_v38 = vadd.f32 %v262_v30, %v241_v37 }
 0x22c   :  { %253 = vst.msk [vmem:[%s435_s6 + $0x10] sm:$0xff] %vm250_vm2, %v242_v38 }
 0x22d   :  { %259 = vsyncpa [#allocation3], 1 }

</bundles_post_ra>
